<compile_context>
chip_gen: v7x
topology: tpu7x:2x2x1
jax: 0.10.0
libtpu: 0.0.40
codegen_flags: <defaults>
</compile_context>

<pallas_src>
import math

import jax
import jax.numpy as jnp
from jax.experimental import pallas as pl
from jax.experimental.pallas import tpu as pltpu


LANE = 128
SUBLANE = 8


def _round_up(x, m):
    return (x + m - 1) // m * m


def mlp_kernel(x_ref, w1_ref, b1_ref, w2_ref, b2_ref, o_ref):
    # f32 -> bf16 cast of the activations happens in-kernel (rides a free VPU
    # slot); the wrapper no longer does a separate HBM cast pass.
    x = x_ref[...].astype(w1_ref.dtype)
    # fc1: [TILE_B, F](bf16) @ [F, Hp](bf16) -> f32 accumulator on the MXU.
    h = jnp.dot(x, w1_ref[...], preferred_element_type=jnp.float32)
    # bias + ReLU stay on the f32 accumulator (v5e-friendly epilogue).
    h = jnp.maximum(h + b1_ref[...], 0.0)
    # fc2: cast activations to bf16 for the MXU, accumulate in f32.
    out = jnp.dot(h.astype(w2_ref.dtype), w2_ref[...],
                  preferred_element_type=jnp.float32)
    out = out + b2_ref[...]
    # bf16 store halves the dominant (class-padded) HBM writeback.
    o_ref[...] = out.astype(o_ref.dtype)


def prepare_mlp_params(w1, b1, w2, b2, compute_dtype=jnp.bfloat16):
    """One-time re-layout of torch-style nn.Linear params (NOT per forward).

    w1: [H, F], b1: [H], w2: [C, H], b2: [C]  (torch layout) ->
      w1t: [F, Hp] bf16, b1p: [1, Hp] f32, w2t: [Hp, Cp] bf16, b2p: [1, Cp] f32
    Zero padding of hidden/class columns keeps the math identical to the
    unpadded MLP (zero weights + zero bias, ReLU(0)=0).
    """
    H, F = w1.shape
    C = w2.shape[0]
    Hp = _round_up(H, LANE)
    Cp = _round_up(C, LANE)

    w1t = jnp.zeros((F, Hp), compute_dtype).at[:, :H].set(w1.T.astype(compute_dtype))
    b1p = jnp.zeros((1, Hp), jnp.float32).at[:, :H].set(b1.astype(jnp.float32))
    w2t = jnp.zeros((Hp, Cp), compute_dtype).at[:H, :C].set(w2.T.astype(compute_dtype))
    b2p = jnp.zeros((1, Cp), jnp.float32).at[:, :C].set(b2.astype(jnp.float32))
    return w1t, b1p, w2t, b2p


def _choose_tile_b(batch, max_tile=1024):
    """Largest sublane-aligned batch tile (<= max_tile) that keeps >= 2 grid
    steps when the batch allows it, so v7x's two TensorCores both get work."""
    if batch <= SUBLANE:
        return SUBLANE
    half = _round_up(-(-batch // 2), SUBLANE)   # ceil(batch/2), sublane-aligned
    return max(SUBLANE, min(max_tile, half))


def mlp_forward(x, w1t, b1p, w2t, b2p, num_classes, max_tile_b=1024):
    """x: [B, F] float32; weights pre-laid-out by prepare_mlp_params."""
    B, F = x.shape
    Hp = w1t.shape[1]
    Cp = w2t.shape[1]

    tile_b = _choose_tile_b(B, max_tile_b)
    # No wrapper-side batch pad: Pallas handles the partial last block (stores
    # past B are masked, garbage padded rows are row-independent).
    grid = (pl.cdiv(B, tile_b),)

    flops = 2 * B * (F * Hp + Hp * Cp)
    bytes_accessed = (
        B * F * 4                       # x (f32 read; cast in-kernel)
        + F * Hp * 2 + Hp * Cp * 2      # weights (bf16), DMA'd once
        + (Hp + Cp) * 4                 # biases (f32)
        + B * Cp * 2                    # padded output (bf16 write)
    )

    out_p = pl.pallas_call(
        mlp_kernel,
        out_shape=jax.ShapeDtypeStruct((B, Cp), jnp.bfloat16),
        grid_spec=pltpu.PrefetchScalarGridSpec(
            num_scalar_prefetch=0,
            grid=grid,
            in_specs=[
                # Activations: tiled over the batch grid axis (auto-pipelined).
                pl.BlockSpec((tile_b, F), lambda i: (i, 0)),
                # Weights / biases: full blocks with constant index_map ->
                # DMA'd once, VMEM-resident across the whole grid.
                pl.BlockSpec((F, Hp), lambda i: (0, 0)),
                pl.BlockSpec((1, Hp), lambda i: (0, 0)),
                pl.BlockSpec((Hp, Cp), lambda i: (0, 0)),
                pl.BlockSpec((1, Cp), lambda i: (0, 0)),
            ],
            out_specs=pl.BlockSpec((tile_b, Cp), lambda i: (i, 0)),
        ),
        # No vmem_limit_bytes pin: footprint is ~1-2 MiB even at tile_b=1024,
        # comfortably inside the default scoped VMEM on every generation.
        compiler_params=pltpu.CompilerParams(
            dimension_semantics=("parallel",),
        ),
        cost_estimate=pl.CostEstimate(
            flops=flops, transcendentals=0, bytes_accessed=bytes_accessed),
    )(x, w1t, b1p, w2t, b2p)

    # Strip class padding; return f32 logits like the torch module.
    return out_p[:, :num_classes].astype(jnp.float32)


def init_linear_params(key, in_features, out_features, dtype=jnp.float32):
    """Deterministic init mimicking torch.nn.Linear default (U(+-1/sqrt(fan_in)))."""
    kw, kb = jax.random.split(key)
    bound = 1.0 / math.sqrt(in_features)
    w = jax.random.uniform(kw, (out_features, in_features), dtype,
                           minval=-bound, maxval=bound)
    b = jax.random.uniform(kb, (out_features,), dtype,
                           minval=-bound, maxval=bound)
    return w, b


if __name__ == "__main__":
    # Shapes consistent with the module: input_size=32 features,
    # hidden_size=100, num_classes=4; batch=256 exercises a 2-step batch grid
    # (128 rows per TensorCore-shardable step).
    batch = 256
    input_size = 32
    hidden_size = 100
    num_classes = 4

    key = jax.random.PRNGKey(0)
    kx, k1, k2 = jax.random.split(key, 3)

    x = jax.random.normal(kx, (batch, input_size), jnp.float32)
    w1, b1 = init_linear_params(k1, input_size, hidden_size)
    w2, b2 = init_linear_params(k2, hidden_size, num_classes)

    # One-time re-layout (outside the forward path).
    w1t, b1p, w2t, b2p = prepare_mlp_params(w1, b1, w2, b2)

    out = mlp_forward(x, w1t, b1p, w2t, b2p, num_classes)
    out = jax.block_until_ready(out)
    assert out.shape == (batch, num_classes)
    assert out.dtype == jnp.float32

    # Tight check: plain-JAX reference using identical bf16 operands, f32
    # accumulation, and the same bf16 output rounding as the kernel.
    xb = x.astype(jnp.bfloat16)
    h_ref = jnp.dot(xb, w1t, preferred_element_type=jnp.float32) + b1p
    h_ref = jnp.maximum(h_ref, 0.0)
    logits = jnp.dot(h_ref.astype(jnp.bfloat16), w2t,
                     preferred_element_type=jnp.float32) + b2p
    ref_bf16 = logits.astype(jnp.bfloat16).astype(jnp.float32)[:, :num_classes]
    assert jnp.allclose(out, ref_bf16, atol=1e-2, rtol=1e-2)

    # Loose sanity check against the full-f32 torch-equivalent forward
    # (bf16 operands introduce ~1e-3..1e-2 absolute differences).
    ref_f32 = jnp.maximum(x @ w1.T + b1, 0.0) @ w2.T + b2
    assert jnp.allclose(out, ref_f32, atol=1e-1, rtol=1e-1)

    print("KERNEL_OK")
</pallas_src>

<mosaic_0001>
module attributes {stable_mosaic.version = 11 : i64} {
  func.func @mlp_kernel(%arg0: i32, %arg1: memref<128x32xf32, #tpu.memory_space<vmem>>, %arg2: memref<32x128xbf16, #tpu.memory_space<vmem>>, %arg3: memref<1x128xf32, #tpu.memory_space<vmem>>, %arg4: memref<128x128xbf16, #tpu.memory_space<vmem>>, %arg5: memref<1x128xf32, #tpu.memory_space<vmem>>, %arg6: memref<128x128xbf16, #tpu.memory_space<vmem>>) attributes {dimension_semantics = [#tpu.dimension_semantics<parallel>], iteration_bounds = array<i64: 2>, scalar_prefetch = 0 : i64, scratch_operands = 0 : i64, tpu.core_type = #tpu.core_type<tc>, window_params = [{transform_indices = @transform_0, window_bounds = array<i64: 128, 32>}, {pipeline_mode = #tpu.pipeline_mode<synchronous>, transform_indices = @transform_1, window_bounds = array<i64: 32, 128>}, {pipeline_mode = #tpu.pipeline_mode<synchronous>, transform_indices = @transform_2, window_bounds = array<i64: 1, 128>}, {pipeline_mode = #tpu.pipeline_mode<synchronous>, transform_indices = @transform_3, window_bounds = array<i64: 128, 128>}, {pipeline_mode = #tpu.pipeline_mode<synchronous>, transform_indices = @transform_4, window_bounds = array<i64: 1, 128>}, {transform_indices = @transform_5, window_bounds = array<i64: 128, 128>}]} {
    %c0 = arith.constant 0 : index
    %c0_0 = arith.constant 0 : index
    %0 = vector.load %arg1[%c0, %c0_0] : memref<128x32xf32, #tpu.memory_space<vmem>>, vector<128x32xf32>
    %1 = arith.truncf %0 : vector<128x32xf32> to vector<128x32xbf16>
    %c0_1 = arith.constant 0 : index
    %c0_2 = arith.constant 0 : index
    %2 = vector.load %arg2[%c0_1, %c0_2] : memref<32x128xbf16, #tpu.memory_space<vmem>>, vector<32x128xbf16>
    %cst = arith.constant dense<0.000000e+00> : vector<128x128xf32>
    %3 = tpu.matmul %1, %2, %cst {dimension_numbers = #tpu.dot_dimension_numbers<[1], [0], [0], [1], [0, 0, 1, 1], [], []>} : vector<128x32xbf16>, vector<32x128xbf16>, vector<128x128xf32> -> vector<128x128xf32>
    %c0_3 = arith.constant 0 : index
    %c0_4 = arith.constant 0 : index
    %4 = vector.load %arg3[%c0_3, %c0_4] : memref<1x128xf32, #tpu.memory_space<vmem>>, vector<1x128xf32>
    %5 = vector.broadcast %4 : vector<1x128xf32> to vector<128x128xf32>
    %6 = arith.addf %3, %5 : vector<128x128xf32>
    %cst_5 = arith.constant 0.000000e+00 : f32
    %7 = vector.broadcast %cst_5 : f32 to vector<128x128xf32>
    %8 = arith.maximumf %6, %7 : vector<128x128xf32>
    %9 = arith.truncf %8 : vector<128x128xf32> to vector<128x128xbf16>
    %c0_6 = arith.constant 0 : index
    %c0_7 = arith.constant 0 : index
    %10 = vector.load %arg4[%c0_6, %c0_7] : memref<128x128xbf16, #tpu.memory_space<vmem>>, vector<128x128xbf16>
    %cst_8 = arith.constant dense<0.000000e+00> : vector<128x128xf32>
    %11 = tpu.matmul %9, %10, %cst_8 {dimension_numbers = #tpu.dot_dimension_numbers<[1], [0], [0], [1], [0, 0, 1, 1], [], []>} : vector<128x128xbf16>, vector<128x128xbf16>, vector<128x128xf32> -> vector<128x128xf32>
    %c0_9 = arith.constant 0 : index
    %c0_10 = arith.constant 0 : index
    %12 = vector.load %arg5[%c0_9, %c0_10] : memref<1x128xf32, #tpu.memory_space<vmem>>, vector<1x128xf32>
    %13 = vector.broadcast %12 : vector<1x128xf32> to vector<128x128xf32>
    %14 = arith.addf %11, %13 : vector<128x128xf32>
    %15 = arith.truncf %14 : vector<128x128xf32> to vector<128x128xbf16>
    %c0_11 = arith.constant 0 : index
    %c0_12 = arith.constant 0 : index
    %16 = vector.load %arg6[%c0_11, %c0_12] : memref<128x128xbf16, #tpu.memory_space<vmem>>, vector<128x128xbf16>
    tpu.vector_store %arg6[%c0_11, %c0_12], %15 {strides = array<i32>} : memref<128x128xbf16, #tpu.memory_space<vmem>>, vector<128x128xbf16>,
    return
  }
  func.func @transform_0(%arg0: i32) -> (i32, i32) {
    %c0_i32 = arith.constant 0 : i32
    %c0_i32_0 = arith.constant 0 : i32
    return %arg0, %c0_i32 : i32, i32
  }
  func.func @transform_1(%arg0: i32) -> (i32, i32) {
    %c0_i32 = arith.constant 0 : i32
    %c0_i32_0 = arith.constant 0 : i32
    %c0_i32_1 = arith.constant 0 : i32
    return %c0_i32, %c0_i32_0 : i32, i32
  }
  func.func @transform_2(%arg0: i32) -> (i32, i32) {
    %c0_i32 = arith.constant 0 : i32
    %c0_i32_0 = arith.constant 0 : i32
    %c0_i32_1 = arith.constant 0 : i32
    return %c0_i32, %c0_i32_0 : i32, i32
  }
  func.func @transform_3(%arg0: i32) -> (i32, i32) {
    %c0_i32 = arith.constant 0 : i32
    %c0_i32_0 = arith.constant 0 : i32
    %c0_i32_1 = arith.constant 0 : i32
    return %c0_i32, %c0_i32_0 : i32, i32
  }
  func.func @transform_4(%arg0: i32) -> (i32, i32) {
    %c0_i32 = arith.constant 0 : i32
    %c0_i32_0 = arith.constant 0 : i32
    %c0_i32_1 = arith.constant 0 : i32
    return %c0_i32, %c0_i32_0 : i32, i32
  }
  func.func @transform_5(%arg0: i32) -> (i32, i32) {
    %c0_i32 = arith.constant 0 : i32
    %c0_i32_0 = arith.constant 0 : i32
    return %arg0, %c0_i32 : i32, i32
  }
}

</mosaic_0001>

<bundles_post_ra>
// kernel: tpu_custom_call.1
= control target key start
LH: loop header
LB: loop body
LE: loop exit
PB: predicated region body
PF: predicated region fallthrough
CT: control target
= control target key end

     0   :  { %10 = vsyncpa [#allocation3], 0  ;;  %s1277_s0 = inlined_call_operand.vmem [shape: f32[256,32], index: 0, kind: input, shape index: {}]   ;;  %s1278_s1 = inlined_call_operand.vmem [shape: bf16[32,128], index: 1, kind: input, shape index: {}]   ;;  %s1279_s2 = inlined_call_operand.vmem [shape: f32[1,128], index: 2, kind: input, shape index: {}]   ;;  %s1280_s3 = inlined_call_operand.vmem [shape: bf16[128,128], index: 3, kind: input, shape index: {}]   ;;  %s1281_s4 = inlined_call_operand.vmem [shape: f32[1,128], index: 4, kind: input, shape index: {}]   ;;  %s1282_s5 = inlined_call_operand.hbm [shape: bf16[256,128], index: 5, kind: output, shape index: {}]  }
   0x1   :  { %12 = vsyncpa [#allocation3 + $0x1], 0  ;;  %s1098_s18 = smov 0   ;;  %s1100_s19 = smov 0  }
   0x2   :  { %s1102_s20 = smov 0   ;;  %s1104_s21 = smov 0  }
   0x3 LB: > { %s1119_s22 = sadd.s32 4294967295, %s1063_s21   ;;  %s744_s23 = sadd.s32 4294967294, %s1063_s21   ;;  %s1063_s21 = sphi %s1104_s21, %s1288_s21   ;;  %s1059_s20 = sphi %s1102_s20, %s1287_s20   ;;  %s1055_s19 = sphi %s1100_s19, %s1286_s19   ;;  %s1051_s18 = sphi %s1098_s18, %s1285_s18  }
   0x4   : > { %s1123_s24 = sadd.s32 1, %s1063_s21   ;;  %s135_s25 = sadd.s32 1, %s1059_s20 }
   0x5   : > { %s132_s26 = ssub.s32 %s1063_s21, %s1123_s24  ;;  %p145_p0 = scmp.ne.s32.totalorder %s1059_s20, %s1055_s19 }
   0x6   : > { %p133_p1 = scmp.eq.s32.totalorder %s132_s26, 0  ;;  %p146_p2 = scmp.eq.s32.totalorder %s1119_s22, 1 }
   0x7   : > { %p151_p3 = scmp.ne.s32.totalorder %s1055_s19, %s1051_s18  ;;  %p152_p4 = scmp.eq.s32.totalorder %s744_s23, 1 }
   0x8   : > { %s1134_s27 = scalar_select %p133_p1, %s1059_s20, %s135_s25  }
   0x9   : > { %p1136_p5 = por %p146_p2, %p145_p0  ;;  %p1140_p6 = por %p152_p4, %p151_p3 }
   0xa   : > { %p747_p7 = scmp.ge.s32.totalorder %s1063_s21, 1  ;;  %p191_p8 = scmp.lt.s32.totalorder %s1063_s21, 3 }
   0xc   : > { %p192_p9 = pnand %p747_p7, %p191_p8 }
   0xd   : > { %v991_v0 = vld [vmem:[%s1278_s1] sm:$0xff] (!%p192_p9)   ;;  %s749_s7 = sshll.u32 (!%p192_p9), %s1119_s22, 4  ;;  %v992_v1 = vld [vmem:[%s1278_s1 + $0x8] sm:$0xff] (!%p192_p9)   ;;  %v995_v4 = vld [vmem:[%s1280_s3 + $0x10] sm:$0xff] (!%p192_p9)   ;;  %vm274_vm0 = vcmask (!%p192_p9), 261120   ;;  %s216_s16 = sand.u32 (!%p192_p9), 1, %s1055_s19  }
   0xe   : > { %195 = sbr.rel (%p192_p9) target bundleno = 508 (0x1fc), region = 40  ;;  %p220_p10 = scmp.lt.s32.totalorder (!%p192_p9), %s749_s7, 31  ;;  %882 = vmatprep.subr.bf16.mxu0 (!%p192_p9), %v991_v0  ;;  %v993_v2 = vld [vmem:[%s1280_s3] sm:$0xff] (!%p192_p9)   ;;  %v994_v3 = vld [vmem:[%s1280_s3 + $0x8] sm:$0xff] (!%p192_p9)   ;;  %v996_v16 = vld [vmem:[%s1280_s3 + $0x18] sm:$0xff] (!%p192_p9)  }
   0xf   : > { %883 = vmatpush3.bf16.msra.mxu0 (!%p192_p9), %v991_v0  ;;  %934 = vmatprep.subr.bf16.mxu1 (!%p192_p9), %v993_v2  ;;  %v997_v21 = vld [vmem:[%s1280_s3 + $0x20] sm:$0xff] (!%p192_p9)   ;;  %v998_v24 = vld [vmem:[%s1280_s3 + $0x28] sm:$0xff] (!%p192_p9)   ;;  %v999_v32 = vld [vmem:[%s1280_s3 + $0x30] sm:$0xff] (!%p192_p9)   ;;  %s748_s25 = sshll.u32 (!%p192_p9), %s216_s16, 6  ;;  %s808_s30 = sshll.u32 (!%p192_p9), %s1119_s22, 10 }
  0x10   : > { %884 = vmatprep.subr.bf16.mxu0 (!%p192_p9), %v992_v1  ;;  %942 = vmatpush3.bf16.msra.mxu1 (!%p192_p9), %v993_v2  ;;  %v1000_v33 = vld [vmem:[%s1280_s3 + $0x38] sm:$0xff] (!%p192_p9)   ;;  %v751_v34 = vld [vmem:[%s1279_s2] ss:$0 sm:$0xff] (!%p192_p9)  ;;  %s1215_s26 = scalar_lea.vmem (!%p192_p9), [#allocation2], %s748_s25  ;;  %s1228_s9 = scalar_lea.hbm (!%p192_p9), %s1282_s5, %s808_s30 }
  0x11   : > { %935 = vmatprep.subr.bf16.mxu1 (!%p192_p9), %v994_v3  ;;  %s682_s6 = sshll.u32 (!%p192_p9), %s1215_s26, 4  ;;  %s1236_s22 = scalar_lea.sflag (!%p192_p9), [#allocation3], %s216_s16  ;;  %s1230_s6 = int_to_ptr.vmem [resolvable:$true] %s682_s6 }
  0x12   : > { %s1001_s10 = scalar_lea.vmem (!%p192_p9), %s1230_s6, 1024  ;;  %s1065_s11 = smov (!%p192_p9), [#allocation2]  }
  0x13   : > { %885 = vmatpush3.bf16.msra.mxu0 (!%p192_p9), %v992_v1  ;;  %p1002_p11 = scmp.ne.s32.totalorder (!%p192_p9), %s1230_s6, %s1001_s10  ;;  %s1005_s12 = sshll.u32 (!%p192_p9), %s1065_s11, 4  ;;  %s1006_s12 = int_to_ptr.vmem [resolvable:$false] %s1005_s12 }
  0x14   : > { %902 = vmatprep.subr.bf16.mxu0 (!%p192_p9), %v993_v2  ;;  %943 = vmatpush3.bf16.msra.mxu1 (!%p192_p9), %v994_v3  ;;  %s1007_s13 = scalar_lea.vmem (!%p192_p9), %s1006_s12, 2048  ;;  %p1008_p0 = scmp.lt.s32.totalorder (!%p192_p9), %s1230_s6, %s1006_s12 }
  0x15   : > { %s1290_s7 = smov (!%p220_p10, %s749_s7), 31  ;;  %936 = vmatprep.subr.bf16.mxu1 %v995_v4  ;;  %p1003_p12 = pnand %p1002_p11, %p1136_p5 }
  0x16   : > { %s750_s14 = sshll.u32 %s1290_s7, 3  ;;  %p1009_p1 = scmp.lt.s32.totalorder %s1007_s13, %s1001_s10 }
  0x17   : > { %s1162_s17 = scalar_lea.vmem %s1277_s0, %s750_s14  ;;  %p1004_p13 = pneg %p1003_p12 }
  0x18   : > { %v227_v5 = vld [vmem:[%s1162_s17] sm:$0xff]  ;;  %v228_v6 = vld [vmem:[%s1162_s17 + $0x8] sm:$0xff]  ;;  %v229_v7 = vld [vmem:[%s1162_s17 + $0x10] sm:$0xff]  ;;  %944 = vmatpush3.bf16.msra.mxu1 %v995_v4  ;;  %p1010_p2 = por %p1009_p1, %p1008_p0 }
  0x19   : > { %v243_v8 = vpack.c.bf16 %v228_v6, %v227_v5  ;;  %v230_v9 = vld [vmem:[%s1162_s17 + $0x18] sm:$0xff]  ;;  %v231_v10 = vld [vmem:[%s1162_s17 + $0x20] sm:$0xff]  ;;  %v232_v11 = vld [vmem:[%s1162_s17 + $0x28] sm:$0xff]  ;;  %937 = vmatprep.subr.bf16.mxu1 %v996_v16 }
  0x1a   : > { %v244_v12 = vpack.c.bf16 %v230_v9, %v229_v7  ;;  %v245_v13 = vpack.c.bf16 %v232_v11, %v231_v10  ;;  %v233_v14 = vld [vmem:[%s1162_s17 + $0x30] sm:$0xff]  ;;  %v234_v15 = vld [vmem:[%s1162_s17 + $0x38] sm:$0xff]  ;;  %v235_v17 = vld [vmem:[%s1162_s17 + $0x40] sm:$0xff]  ;;  %p1011_p3 = pnand %p1010_p2, %p1004_p13 }
  0x1b   : > { %886 = vmatprep.mubr.msk.bf16.mxu0 %vm274_vm0, %v243_v8  ;;  %v236_v18 = vld [vmem:[%s1162_s17 + $0x48] sm:$0xff]  ;;  %v246_v19 = vpack.c.bf16 %v234_v15, %v233_v14  ;;  %v237_v22 = vld [vmem:[%s1162_s17 + $0x50] sm:$0xff]  ;;  %v238_v23 = vld [vmem:[%s1162_s17 + $0x58] sm:$0xff] }
  0x1c   : > { %887 = vmatmul.mubr.msk.bf16.vlgmr.msra.gmra.mrb[0].mxu0 %vm274_vm0, %v244_v12  ;;  %v247_v20 = vpack.c.bf16 %v236_v18, %v235_v17  ;;  %945 = vmatpush3.bf16.msra.mxu1 %v996_v16  ;;  %v239_v25 = vld [vmem:[%s1162_s17 + $0x60] sm:$0xff]  ;;  %v240_v26 = vld [vmem:[%s1162_s17 + $0x68] sm:$0xff]  ;;  %v248_v27 = vpack.c.bf16 %v238_v23, %v237_v22  ;;  %v241_v29 = vld [vmem:[%s1162_s17 + $0x70] sm:$0xff] }
  0x1d   : > { %890 = vmatprep.mubr.msk.bf16.mxu0 %vm274_vm0, %v245_v13  ;;  %903 = vmatpush3.bf16.msra.mxu0 %v993_v2  ;;  %v249_v28 = vpack.c.bf16 %v240_v26, %v239_v25  ;;  %v242_v30 = vld [vmem:[%s1162_s17 + $0x78] sm:$0xff] }
  0x1e   : > { %904 = vmatprep.subr.bf16.mxu0 %v994_v3  ;;  %938 = vmatprep.subr.bf16.mxu1 %v997_v21  ;;  %v250_v31 = vpack.c.bf16 %v242_v30, %v241_v29 }
  0x20   : > { %946 = vmatpush3.bf16.msra.mxu1 %v997_v21 }
  0x21   : > { %905 = vmatpush3.bf16.msra.mxu0 %v994_v3  ;;  %939 = vmatprep.subr.bf16.mxu1 %v998_v24 }
  0x22   : > { %906 = vmatprep.subr.bf16.mxu0 %v995_v4 }
  0x24   : > { %891 = vmatmul.mubr.msk.bf16.gmra.mrb[4].mxu0 %vm274_vm0, %v246_v19  ;;  %947 = vmatpush3.bf16.msra.mxu1 %v998_v24 }
  0x25   : > { %894 = vmatprep.mubr.msk.bf16.mxu0 %vm274_vm0, %v247_v20  ;;  %907 = vmatpush3.bf16.msra.mxu0 %v995_v4 }
  0x26   : > { %908 = vmatprep.subr.bf16.mxu0 %v996_v16  ;;  %940 = vmatprep.subr.bf16.mxu1 %v999_v32 }
  0x28   : > { %948 = vmatpush3.bf16.msra.mxu1 %v999_v32 }
  0x29   : > { %909 = vmatpush3.bf16.msra.mxu0 %v996_v16  ;;  %941 = vmatprep.subr.bf16.mxu1 %v1000_v33 }
  0x2a   : > { %910 = vmatprep.subr.bf16.mxu0 %v997_v21 }
  0x2c   : > { %895 = vmatmul.mubr.msk.bf16.gmra.mrb[8].mxu0 %vm274_vm0, %v248_v27  ;;  %949 = vmatpush3.bf16.msra.mxu1 %v1000_v33 }
  0x2d   : > { %898 = vmatprep.mubr.msk.bf16.mxu0 %vm274_vm0, %v249_v28  ;;  %911 = vmatpush3.bf16.msra.mxu0 %v997_v21  ;;  %v762_v28 = vld [vmem:[%s1281_s4] ss:$0 sm:$0xff] }
  0x2e   : > { %912 = vmatprep.subr.bf16.mxu0 %v998_v24 }
  0x31   : > { %913 = vmatpush3.bf16.msra.mxu0 %v998_v24 }
  0x32   : > { %914 = vmatprep.subr.bf16.mxu0 %v999_v32 }
  0x34   : > { %899 = vmatmul.mubr.msk.bf16.gmra.mrb[12].mxu0 %vm274_vm0, %v250_v31 }
  0x35   : > { %915 = vmatpush3.bf16.msra.mxu0 %v999_v32 }
  0x36   : > { %916 = vmatprep.subr.bf16.mxu0 %v1000_v33 }
  0x39   : > { %917 = vmatpush3.bf16.msra.mxu0 %v1000_v33 }
  0xef   : > { %v888_v35 = vpop.f32.mrb[0].mxu0 }
  0xf0   : > { %v342_v36 = vadd.f32 %v888_v35, %v751_v34  ;;  %v333_v37 = vpop.f32.mrb[1].mxu0 }
  0xf1   : > { %v334_v38 = vadd.f32 %v751_v34, %v333_v37  ;;  %v889_v39 = vpop.f32.mrb[2].mxu0 }
  0xf2   : > { %v345_v40 = vadd.f32 %v889_v39, %v751_v34  ;;  %v336_v41 = vpop.f32.mrb[3].mxu0  ;;  %v398_v43 = vmax.f32 %v342_v36, 0.0 }
  0xf3   : > { %v337_v42 = vadd.f32 %v751_v34, %v336_v41  ;;  %v396_v45 = vmax.f32 %v334_v38, 0.0 }
  0xf4   : > { %v399_v44 = vmax.f32 %v345_v40, 0.0 }
  0xf5   : > { %v397_v46 = vmax.f32 %v337_v42, 0.0 }
  0xf6   : > { %v413_v47 = vpack.c.bf16 %v399_v44, %v398_v43 }
  0xf7   : > { %v412_v48 = vpack.c.bf16 %v397_v46, %v396_v45  ;;  %v892_v49 = vpop.f32.mrb[4].mxu0 }
  0xf8   : > { %v358_v50 = vadd.f32 %v892_v49, %v751_v34  ;;  %v349_v51 = vpop.f32.mrb[5].mxu0 }
  0xf9   : > { %v350_v52 = vadd.f32 %v751_v34, %v349_v51  ;;  %v893_v53 = vpop.f32.mrb[6].mxu0  ;;  %918 = vmatprep.mubr.bf16.mxu0 %v412_v48 }
  0xfa   : > { %v361_v54 = vadd.f32 %v893_v53, %v751_v34  ;;  %v352_v55 = vpop.f32.mrb[7].mxu0  ;;  %919 = vmatmul.mubr.bf16.vlgmr.msra.gmra.mrb[16].mxu0 %v413_v47  ;;  %v402_v57 = vmax.f32 %v358_v50, 0.0 }
  0xfb   : > { %v353_v56 = vadd.f32 %v751_v34, %v352_v55  ;;  %v400_v59 = vmax.f32 %v350_v52, 0.0 }
  0xfc   : > { %v403_v58 = vmax.f32 %v361_v54, 0.0 }
  0xfd   : > { %v401_v60 = vmax.f32 %v353_v56, 0.0 }
  0xfe   : > { %v415_v61 = vpack.c.bf16 %v403_v58, %v402_v57 }
  0xff   : > { %v896_v62 = vpop.f32.mrb[8].mxu0  ;;  %v414_v63 = vpack.c.bf16 %v401_v60, %v400_v59 }
 0x100   : > { %v374_v0 = vadd.f32 %v896_v62, %v751_v34  ;;  %v365_v1 = vpop.f32.mrb[9].mxu0 }
 0x101   : > { %v366_v2 = vadd.f32 %v751_v34, %v365_v1  ;;  %v897_v3 = vpop.f32.mrb[10].mxu0  ;;  %922 = vmatprep.mubr.bf16.mxu1 %v414_v63 }
 0x102   : > { %v377_v4 = vadd.f32 %v897_v3, %v751_v34  ;;  %v368_v5 = vpop.f32.mrb[11].mxu0  ;;  %923 = vmatmul.mubr.bf16.vlgmr.msra.gmra.mrb[0].mxu1 %v415_v61  ;;  %v406_v7 = vmax.f32 %v374_v0, 0.0 }
 0x103   : > { %v369_v6 = vadd.f32 %v751_v34, %v368_v5  ;;  %v404_v9 = vmax.f32 %v366_v2, 0.0 }
 0x104   : > { %v407_v8 = vmax.f32 %v377_v4, 0.0 }
 0x105   : > { %v405_v10 = vmax.f32 %v369_v6, 0.0 }
 0x106   : > { %v417_v11 = vpack.c.bf16 %v407_v8, %v406_v7 }
 0x107   : > { %v416_v12 = vpack.c.bf16 %v405_v10, %v404_v9  ;;  %v900_v13 = vpop.f32.mrb[12].mxu0 }
 0x108   : > { %v390_v14 = vadd.f32 %v900_v13, %v751_v34  ;;  %v381_v15 = vpop.f32.mrb[13].mxu0 }
 0x109   : > { %v382_v16 = vadd.f32 %v751_v34, %v381_v15  ;;  %v901_v17 = vpop.f32.mrb[14].mxu0  ;;  %926 = vmatprep.mubr.bf16.mxu1 %v416_v12 }
 0x10a   : > { %v393_v18 = vadd.f32 %v901_v17, %v751_v34  ;;  %v384_v19 = vpop.f32.mrb[15].mxu0  ;;  %927 = vmatmul.mubr.bf16.gmra.mrb[4].mxu1 %v417_v11  ;;  %v410_v21 = vmax.f32 %v390_v14, 0.0 }
 0x10b   : > { %v385_v20 = vadd.f32 %v751_v34, %v384_v19  ;;  %v408_v23 = vmax.f32 %v382_v16, 0.0 }
 0x10c   : > { %v411_v22 = vmax.f32 %v393_v18, 0.0 }
 0x10d   : > { %v409_v24 = vmax.f32 %v385_v20, 0.0 }
 0x10e   : > { %v419_v25 = vpack.c.bf16 %v411_v22, %v410_v21 }
 0x10f   : > { %v418_v26 = vpack.c.bf16 %v409_v24, %v408_v23 }
 0x111   : > { %930 = vmatprep.mubr.bf16.mxu1 %v418_v26 }
 0x112   : > { %931 = vmatmul.mubr.bf16.gmra.mrb[8].mxu1 %v419_v25 }
 0x1cd   : > { %v920_v27 = vpop.f32.mrb[16].mxu0 }
 0x1ce   : > { %v525_v29 = vpop.f32.mrb[17].mxu0  ;;  %v534_v31 = vadd.f32 %v920_v27, %v762_v28 }
 0x1cf   : > { %v921_v30 = vpop.f32.mrb[18].mxu0  ;;  %v526_v34 = vadd.f32 %v762_v28, %v525_v29 }
 0x1d0   : > { %v537_v32 = vadd.f32 %v921_v30, %v762_v28  ;;  %v528_v33 = vpop.f32.mrb[19].mxu0 }
 0x1d1   : > { %v529_v35 = vadd.f32 %v762_v28, %v528_v33 }
 0x1d2   : > { %v817_v36 = vpack.c.bf16 %v537_v32, %v534_v31 }
 0x1d3   : > { %v812_v37 = vpack.c.bf16 %v529_v35, %v526_v34 }
 0x1d4   : > { %849 = vst [vmem:[%s1215_s26 + $0x8] sm:$0xff] %v817_v36  }
 0x1d5   : > { %813 = vst [vmem:[%s1215_s26] sm:$0xff] %v812_v37   ;;  %v924_v38 = vpop.f32.mrb[0].mxu1 }
 0x1d6   : > { %v541_v39 = vpop.f32.mrb[1].mxu1  ;;  %v550_v41 = vadd.f32 %v924_v38, %v762_v28 }
 0x1d7   : > { %v925_v40 = vpop.f32.mrb[2].mxu1  ;;  %v542_v44 = vadd.f32 %v762_v28, %v541_v39 }
 0x1d8   : > { %v553_v42 = vadd.f32 %v925_v40, %v762_v28  ;;  %v544_v43 = vpop.f32.mrb[3].mxu1 }
 0x1d9   : > { %v545_v45 = vadd.f32 %v762_v28, %v544_v43 }
 0x1da   : > { %v827_v46 = vpack.c.bf16 %v553_v42, %v550_v41 }
 0x1db   : > { %v822_v47 = vpack.c.bf16 %v545_v45, %v542_v44 }
 0x1dc   : > { %851 = vst [vmem:[%s1215_s26 + $0x18] sm:$0xff] %v827_v46  }
 0x1dd   : > { %850 = vst [vmem:[%s1215_s26 + $0x10] sm:$0xff] %v822_v47   ;;  %v928_v48 = vpop.f32.mrb[4].mxu1 }
 0x1de   : > { %v557_v49 = vpop.f32.mrb[5].mxu1  ;;  %v566_v51 = vadd.f32 %v928_v48, %v762_v28 }
 0x1df   : > { %v929_v50 = vpop.f32.mrb[6].mxu1  ;;  %v558_v54 = vadd.f32 %v762_v28, %v557_v49 }
 0x1e0   : > { %v569_v52 = vadd.f32 %v929_v50, %v762_v28  ;;  %v560_v53 = vpop.f32.mrb[7].mxu1 }
 0x1e1   : > { %v561_v55 = vadd.f32 %v762_v28, %v560_v53 }
 0x1e2   : > { %v837_v56 = vpack.c.bf16 %v569_v52, %v566_v51 }
 0x1e3   : > { %v832_v57 = vpack.c.bf16 %v561_v55, %v558_v54 }
 0x1e4   : > { %853 = vst [vmem:[%s1215_s26 + $0x28] sm:$0xff] %v837_v56  }
 0x1e5   : > { %852 = vst [vmem:[%s1215_s26 + $0x20] sm:$0xff] %v832_v57   ;;  %v932_v58 = vpop.f32.mrb[8].mxu1 }
 0x1e6   : > { %v573_v59 = vpop.f32.mrb[9].mxu1  ;;  %v582_v61 = vadd.f32 %v932_v58, %v762_v28 }
 0x1e7   : > { %v933_v60 = vpop.f32.mrb[10].mxu1  ;;  %v574_v0 = vadd.f32 %v762_v28, %v573_v59 }
 0x1e8   : > { %v585_v62 = vadd.f32 %v933_v60, %v762_v28  ;;  %v576_v63 = vpop.f32.mrb[11].mxu1 }
 0x1e9   : > { %v577_v1 = vadd.f32 %v762_v28, %v576_v63 }
 0x1ea   : > { %v847_v2 = vpack.c.bf16 %v585_v62, %v582_v61 }
 0x1eb   : > { %v842_v3 = vpack.c.bf16 %v577_v1, %v574_v0 }
 0x1ec   : > { %855 = vst [vmem:[%s1215_s26 + $0x38] sm:$0xff] %v847_v2  }
 0x1ed   : > { %854 = vst [vmem:[%s1215_s26 + $0x30] sm:$0xff] %v842_v3  }
 0x1ee   : > { %1014 = shalt.err (!%p1011_p3)
}
 0x1ef   : > { %s1015_s14 = scalar_lea.hbm %s1228_s9, 1024  ;;  %s1019_s17 = scalar_lea.hbm %s1282_s5, 2048 }
 0x1f0   : > { %p1016_p4 = scmp.ne.s32.totalorder %s1228_s9, %s1015_s14  ;;  %p1020_p9 = scmp.lt.u32.totalorder %s1228_s9, %s1282_s5 }
 0x1f1   : > { %p1021_p10 = scmp.lt.u32.totalorder %s1019_s17, %s1015_s14  ;;  %p1023_p12 = scmp.lt.u32.totalorder %s1015_s14, %s1228_s9 }
 0x1f2   : > { %p1017_p7 = pnand %p1016_p4, %p1136_p5 }
 0x1f3   : > { %p1022_p11 = por %p1021_p10, %p1020_p9 }
 0x1f4   : > { %p1018_p8 = pneg %p1017_p7 }
 0x1f5   : > { %p1024_p13 = por %p1023_p12, %p1022_p11 }
 0x1f7   : > { %p1025_p0 = pnand %p1024_p13, %p1018_p8 }
 0x1f9   : > { %1028 = shalt.err (!%p1025_p0)
}
 0x1fa   : > { %s1066_s26 = smov 64   ;;  %s1067_s30 = smov 4  }
 0x1fb   : > { %950 = dma.vmem_to_hbm [thread:$0]  (%p1136_p5), %s1230_s6, 1024, %s1228_s9, %s1236_s22, %s1066_s26, %s1066_s26, %s1067_s30  }
 0x1fc PF: > { %p956_p1 = scmp.ge.s32.totalorder %s1063_s21, 2  ;;  %s697_s7 = sand.u32 1, %s1051_s18  }
 0x1fd   : > { %s698_s8 = scalar_lea.sflag [#allocation3], %s697_s7 }
 0x1fe   : > { %p953_p2 = pnand %p956_p1, %p1140_p6 }
 0x200   : > { %1046 = dma.done.wait (!%p953_p2), %s698_s8, 1024  }
 0x201   : > { %1048 = vsyncadd (!%p953_p2), %s698_s8, 4294966272  ;;  %p15_p3 = scmp.ge.s32.totalorder %s1123_s24, 4   ;;  %s1285_s18 = smov %s1055_s19 }
 0x202   : > { %s1286_s19 = smov %s1059_s20  ;;  %s1287_s20 = smov %s1134_s27 }
 0x203   : > { %s1288_s21 = smov %s1123_s24  ;;  %17 = sbr.rel (!%p15_p3) target bundleno = 3 (0x3), region = 75 }
 0x20a   :  { %703 = vsyncpa [#allocation3], 1 }
 0x20b   :  { %705 = vsyncpa [#allocation3 + $0x1], 1 }

</bundles_post_ra>
